<compile_context>
chip_gen: v7x
topology: tpu7x:2x2x1
jax: 0.10.0
libtpu: 0.0.40
codegen_flags: <defaults>
</compile_context>

<pallas_src>
import functools

import jax
import jax.numpy as jnp
from jax.experimental import pallas as pl
from jax.experimental.pallas import tpu as pltpu

DEFAULT_ENTROPIC_SCALE = 10.0
_OUT_SUB, _OUT_LANE = 8, 128   # one lane-dense f32 vreg per batch tile's partial sum
_MAX_CLASS_CHUNK = 2048        # class-chunk width for the online-logsumexp grid axis
_MAX_TILE_ROWS = 32768         # soft cap: wire block already at the HBM roofline plateau


def _isomax_kernel(logits_ref, targets_ref, partial_ref, m_sc, l_sc, xt_sc, *,
                   n_rows, tile_n, entropic_scale, class_chunk):
    i = pl.program_id(0)                # batch tile
    k = pl.program_id(1)                # class chunk
    nk = pl.num_programs(1)
    s = jnp.float32(entropic_scale)

    @pl.when(k == 0)
    def _():
        m_sc[...] = jnp.full_like(m_sc, -jnp.inf)   # running (unscaled) row max
        l_sc[...] = jnp.zeros_like(l_sc)            # running sum of exp(s*(x - m))
        xt_sc[...] = jnp.zeros_like(xt_sc)          # gathered (unscaled) target logit

    x = logits_ref[...]                              # [tile_n, chunk], native dtype
    t = targets_ref[...]                             # [tile_n, 1] int32
    col = jax.lax.broadcasted_iota(jnp.int32, x.shape, 1) + k * class_chunk

    # Row max + one-hot target gather in the native dtype (exact for bf16); the
    # entropic scale is deferred to the [tile_n, 1] results.
    m_chunk = jnp.max(x, axis=1, keepdims=True).astype(jnp.float32)
    xt_chunk = jnp.sum(jnp.where(col == t, x, jnp.zeros_like(x)),
                       axis=1, keepdims=True).astype(jnp.float32)

    # Online logsumexp update; only this pass is full-width f32.
    m_old = m_sc[...]
    m_new = jnp.maximum(m_old, m_chunk)
    e = jnp.exp(s * (x.astype(jnp.float32) - m_new))
    l_sc[...] = l_sc[...] * jnp.exp(s * (m_old - m_new)) + jnp.sum(
        e, axis=1, keepdims=True)
    m_sc[...] = m_new
    xt_sc[...] = xt_sc[...] + xt_chunk

    @pl.when(k == nk - 1)
    def _():
        # per_sample = logsumexp(s*x) - s*x_t = log(l) + s*(m - x_t)
        per_sample = jnp.log(l_sc[...]) + s * (m_sc[...] - xt_sc[...])
        # Mask padded rows of the last (partial) batch tile; jnp.where drops any
        # garbage/NaN coming from the out-of-bounds padded region.
        row = jax.lax.broadcasted_iota(jnp.int32, (tile_n, 1), 0) + i * tile_n
        per_sample = jnp.where(row < n_rows, per_sample, 0.0)
        partial_ref[...] = jnp.full((1, _OUT_SUB, _OUT_LANE), jnp.sum(per_sample),
                                    dtype=jnp.float32)


def _vmem_config():
    """(vmem_limit_bytes, per-step VMEM working-set budget) per TPU generation."""
    try:
        kind = jax.devices()[0].device_kind.lower()
    except Exception:
        kind = ""
    if "v7" in kind or "7x" in kind:
        # v7x: only 64 MiB physical VMEM per TensorCore -> keep blocks modest.
        return 44 * 2**20, 30 * 2**20
    if any(g in kind for g in ("v6", "v5", "v4")):
        # 128 MiB physical VMEM; DMA-bound kernel -> big blocks amortize per-step cost.
        return 96 * 2**20, 72 * 2**20
    # Unknown generation: conservative (matches the previously-validated config).
    return 32 * 2**20, 22 * 2**20


def _choose_class_chunk(c):
    if c <= _MAX_CLASS_CHUNK:
        return c
    # Largest 128-aligned divisor of C not exceeding the chunk cap.
    for cand in range(_MAX_CLASS_CHUNK, 127, -128):
        if c % cand == 0:
            return cand
    # TODO(synk): mask a ragged last class chunk instead of falling back to one pass.
    return c


def _choose_tile_n(n, class_chunk, itemsize, budget_bytes):
    # Sublane alignment: 8 rows for 4-byte dtypes, 16 for 2-byte, 32 for 1-byte.
    align = 8 if itemsize >= 4 else (16 if itemsize == 2 else 32)
    # Per-row VMEM footprint of one grid step, counted on the f32 working set:
    #   2x double-buffered wire chunk (+ targets) + ~4 chunk-wide f32 temporaries
    #   (x_f32, exp, column iota, one-hot select) + 3 f32 scratch accumulators.
    per_row = 2 * (class_chunk * itemsize + 4) + 4 * class_chunk * 4 + 3 * 4
    rows = budget_bytes // max(1, per_row)
    rows = max(align, (rows // align) * align)
    rows = min(rows, _MAX_TILE_ROWS)
    n_pad = -(-n // align) * align
    rows = min(rows, n_pad)
    # Keep the batch grid >= 2 steps so megacore (v7x) can shard the parallel axis.
    if rows >= n and n > 2 * align:
        half = (n + 1) // 2
        rows = ((half + align - 1) // align) * align
    return max(align, rows)


def isomax_loss_second_part(logits, targets,
                            entropic_scale=DEFAULT_ENTROPIC_SCALE, tile_n=None):
    """logits: [N, C] float (any float dtype), targets: [N] int -> scalar f32 loss."""
    n, c = logits.shape
    itemsize = jnp.dtype(logits.dtype).itemsize

    class_chunk = _choose_class_chunk(c)
    num_chunks = c // class_chunk

    vmem_limit, budget = _vmem_config()
    if tile_n is None:
        tile_n = _choose_tile_n(n, class_chunk, itemsize, budget)
    num_tiles = -(-n // tile_n)

    targets2d = targets.astype(jnp.int32).reshape(n, 1)

    kernel = functools.partial(
        _isomax_kernel,
        n_rows=n, tile_n=tile_n,
        entropic_scale=float(entropic_scale),
        class_chunk=class_chunk,
    )

    cost = pl.CostEstimate(
        flops=8 * n * c,
        transcendentals=n * c + 2 * n,
        bytes_accessed=n * c * itemsize + n * 4
                       + num_tiles * _OUT_SUB * _OUT_LANE * 4,
    )

    partials = pl.pallas_call(
        kernel,
        out_shape=jax.ShapeDtypeStruct((num_tiles, _OUT_SUB, _OUT_LANE), jnp.float32),
        grid=(num_tiles, num_chunks),
        in_specs=[
            pl.BlockSpec((tile_n, class_chunk), lambda i, k: (i, k)),
            pl.BlockSpec((tile_n, 1), lambda i, k: (i, 0)),
        ],
        out_specs=pl.BlockSpec((1, _OUT_SUB, _OUT_LANE), lambda i, k: (i, 0, 0)),
        scratch_shapes=[pltpu.VMEM((tile_n, 1), jnp.float32)] * 3,
        compiler_params=pltpu.CompilerParams(
            dimension_semantics=("parallel", "arbitrary"),
            vmem_limit_bytes=vmem_limit,
        ),
        cost_estimate=cost,
    )(logits, targets2d)

    # Tiny final reduction over num_tiles partial sums; divide by the TRUE N.
    return jnp.sum(partials[:, 0, 0]) / jnp.float32(n)


def isomax_loss_reference(logits, targets, entropic_scale=DEFAULT_ENTROPIC_SCALE):
    z = entropic_scale * logits.astype(jnp.float32)
    logp = jax.nn.log_softmax(z, axis=1)
    return -jnp.mean(logp[jnp.arange(logits.shape[0]), targets])


if __name__ == "__main__":
    key = jax.random.PRNGKey(0)
    k1, k2, k3, k4, k5, k6 = jax.random.split(key, 6)

    # Case 1: multi-tile batch grid (tile_n=16 -> 3 steps) with a partial last tile.
    N1, C1 = 40, 32
    logits1 = jax.random.normal(k1, (N1, C1), dtype=jnp.float32)
    targets1 = jax.random.randint(k2, (N1,), 0, C1, dtype=jnp.int32)
    loss1 = jax.block_until_ready(isomax_loss_second_part(logits1, targets1, tile_n=16))
    ref1 = isomax_loss_reference(logits1, targets1)
    assert jnp.allclose(loss1, ref1, atol=1e-4, rtol=1e-4), (loss1, ref1)

    # Case 2: auto tile size, N not a multiple of 8 (exercises padded-row masking).
    N2, C2 = 13, 64
    logits2 = jax.random.normal(k3, (N2, C2), dtype=jnp.float32)
    targets2 = jax.random.randint(k4, (N2,), 0, C2, dtype=jnp.int32)
    loss2 = jax.block_until_ready(isomax_loss_second_part(logits2, targets2))
    ref2 = isomax_loss_reference(logits2, targets2)
    assert jnp.allclose(loss2, ref2, atol=1e-4, rtol=1e-4), (loss2, ref2)

    # Case 3: bf16 logits stay bf16 on the HBM wire and for the max/gather passes;
    # only the exp-sum runs in f32.
    logits3 = logits1.astype(jnp.bfloat16)
    loss3 = jax.block_until_ready(isomax_loss_second_part(logits3, targets1, tile_n=16))
    ref3 = isomax_loss_reference(logits3.astype(jnp.float32), targets1)
    assert jnp.allclose(loss3, ref3, atol=2e-3, rtol=2e-3), (loss3, ref3)

    # Case 4: wide class axis (C > 2048) exercising the online-logsumexp class-chunk
    # grid axis plus the >=2-batch-tile rule.
    N4, C4 = 24, 4096
    logits4 = jax.random.normal(k5, (N4, C4), dtype=jnp.float32)
    targets4 = jax.random.randint(k6, (N4,), 0, C4, dtype=jnp.int32)
    loss4 = jax.block_until_ready(isomax_loss_second_part(logits4, targets4))
    ref4 = isomax_loss_reference(logits4, targets4)
    assert jnp.allclose(loss4, ref4, atol=1e-3, rtol=1e-3), (loss4, ref4)

    # TODO(synk): debug=True branch (boolean-mask extraction of intra/inter distances
    # into variable-length tensors) has no static-shape Pallas equivalent.
    print("KERNEL_OK")
</pallas_src>

<mosaic_0001>
module attributes {stable_mosaic.version = 11 : i64} {
  func.func @_isomax_kernel(%arg0: i32, %arg1: i32, %arg2: memref<16x32xf32, #tpu.memory_space<vmem>>, %arg3: memref<16x1xi32, #tpu.memory_space<vmem>>, %arg4: memref<1x8x128xf32, #tpu.memory_space<vmem>>, %arg5: memref<16x1xf32, #tpu.memory_space<vmem>>, %arg6: memref<16x1xf32, #tpu.memory_space<vmem>>, %arg7: memref<16x1xf32, #tpu.memory_space<vmem>>) attributes {dimension_semantics = [#tpu.dimension_semantics<parallel>, #tpu.dimension_semantics<arbitrary>], iteration_bounds = array<i64: 3, 1>, scalar_prefetch = 0 : i64, scratch_operands = 3 : i64, tpu.core_type = #tpu.core_type<tc>, window_params = [{transform_indices = @transform_0, window_bounds = array<i64: 16, 32>}, {transform_indices = @transform_1, window_bounds = array<i64: 16, 1>}, {transform_indices = @transform_2, window_bounds = array<i64: 1, 8, 128>}]} {
    %c0_i32 = arith.constant 0 : i32
    %0 = arith.cmpi eq, %arg1, %c0_i32 : i32
    %1 = arith.extui %0 : i1 to i32
    %c0_i32_0 = arith.constant 0 : i32
    %2 = arith.cmpi ne, %1, %c0_i32_0 : i32
    scf.if %2 {
      %cst_24 = arith.constant 0xFF800000 : f32
      %41 = vector.broadcast %cst_24 : f32 to vector<16x1xf32>
      %c0_25 = arith.constant 0 : index
      %c0_26 = arith.constant 0 : index
      %42 = vector.load %arg5[%c0_25, %c0_26] : memref<16x1xf32, #tpu.memory_space<vmem>>, vector<16x1xf32>
      tpu.vector_store %arg5[%c0_25, %c0_26], %41 {strides = array<i32>} : memref<16x1xf32, #tpu.memory_space<vmem>>, vector<16x1xf32>,
      %cst_27 = arith.constant 0.000000e+00 : f32
      %43 = vector.broadcast %cst_27 : f32 to vector<16x1xf32>
      %c0_28 = arith.constant 0 : index
      %c0_29 = arith.constant 0 : index
      %44 = vector.load %arg6[%c0_28, %c0_29] : memref<16x1xf32, #tpu.memory_space<vmem>>, vector<16x1xf32>
      tpu.vector_store %arg6[%c0_28, %c0_29], %43 {strides = array<i32>} : memref<16x1xf32, #tpu.memory_space<vmem>>, vector<16x1xf32>,
      %cst_30 = arith.constant 0.000000e+00 : f32
      %45 = vector.broadcast %cst_30 : f32 to vector<16x1xf32>
      %c0_31 = arith.constant 0 : index
      %c0_32 = arith.constant 0 : index
      %46 = vector.load %arg7[%c0_31, %c0_32] : memref<16x1xf32, #tpu.memory_space<vmem>>, vector<16x1xf32>
      tpu.vector_store %arg7[%c0_31, %c0_32], %45 {strides = array<i32>} : memref<16x1xf32, #tpu.memory_space<vmem>>, vector<16x1xf32>,
    } else {
    }
    %c0 = arith.constant 0 : index
    %c0_1 = arith.constant 0 : index
    %3 = vector.load %arg2[%c0, %c0_1] : memref<16x32xf32, #tpu.memory_space<vmem>>, vector<16x32xf32>
    %c0_2 = arith.constant 0 : index
    %c0_3 = arith.constant 0 : index
    %4 = vector.load %arg3[%c0_2, %c0_3] : memref<16x1xi32, #tpu.memory_space<vmem>>, vector<16x1xi32>
    %5 = tpu.iota {dimensions = array<i32: 1>} : vector<16x32xi32>
    %c32_i32 = arith.constant 32 : i32
    %6 = arith.muli %arg1, %c32_i32 : i32
    %7 = vector.broadcast %6 : i32 to vector<16x32xi32>
    %8 = arith.addi %5, %7 : vector<16x32xi32>
    %cst = arith.constant dense<0xFF800000> : vector<16xf32>
    %9 = vector.multi_reduction <maximumf>, %3, %cst [1] : vector<16x32xf32> to vector<16xf32>
    %10 = vector.shape_cast %9 : vector<16xf32> to vector<16x1xf32>
    %11 = vector.broadcast %4 : vector<16x1xi32> to vector<16x32xi32>
    %12 = arith.cmpi eq, %8, %11 : vector<16x32xi32>
    %cst_4 = arith.constant 0.000000e+00 : f32
    %13 = vector.broadcast %cst_4 : f32 to vector<16x32xf32>
    %14 = arith.select %12, %3, %13 : vector<16x32xi1>, vector<16x32xf32>
    %cst_5 = arith.constant dense<0.000000e+00> : vector<16xf32>
    %15 = vector.multi_reduction <add>, %14, %cst_5 [1] : vector<16x32xf32> to vector<16xf32>
    %16 = vector.shape_cast %15 : vector<16xf32> to vector<16x1xf32>
    %c0_6 = arith.constant 0 : index
    %c0_7 = arith.constant 0 : index
    %17 = vector.load %arg5[%c0_6, %c0_7] : memref<16x1xf32, #tpu.memory_space<vmem>>, vector<16x1xf32>
    %18 = arith.maximumf %17, %10 : vector<16x1xf32>
    %19 = vector.broadcast %18 : vector<16x1xf32> to vector<16x32xf32>
    %20 = arith.subf %3, %19 : vector<16x32xf32>
    %cst_8 = arith.constant 1.000000e+01 : f32
    %21 = vector.broadcast %cst_8 : f32 to vector<16x32xf32>
    %22 = arith.mulf %21, %20 : vector<16x32xf32>
    %23 = math.exp %22 : vector<16x32xf32>
    %c0_9 = arith.constant 0 : index
    %c0_10 = arith.constant 0 : index
    %24 = vector.load %arg6[%c0_9, %c0_10] : memref<16x1xf32, #tpu.memory_space<vmem>>, vector<16x1xf32>
    %25 = arith.subf %17, %18 : vector<16x1xf32>
    %cst_11 = arith.constant 1.000000e+01 : f32
    %26 = vector.broadcast %cst_11 : f32 to vector<16x1xf32>
    %27 = arith.mulf %26, %25 : vector<16x1xf32>
    %28 = math.exp %27 : vector<16x1xf32>
    %29 = arith.mulf %24, %28 : vector<16x1xf32>
    %cst_12 = arith.constant dense<0.000000e+00> : vector<16xf32>
    %30 = vector.multi_reduction <add>, %23, %cst_12 [1] : vector<16x32xf32> to vector<16xf32>
    %31 = vector.shape_cast %30 : vector<16xf32> to vector<16x1xf32>
    %32 = arith.addf %29, %31 : vector<16x1xf32>
    %c0_13 = arith.constant 0 : index
    %c0_14 = arith.constant 0 : index
    %33 = vector.load %arg6[%c0_13, %c0_14] : memref<16x1xf32, #tpu.memory_space<vmem>>, vector<16x1xf32>
    tpu.vector_store %arg6[%c0_13, %c0_14], %32 {strides = array<i32>} : memref<16x1xf32, #tpu.memory_space<vmem>>, vector<16x1xf32>,
    %c0_15 = arith.constant 0 : index
    %c0_16 = arith.constant 0 : index
    %34 = vector.load %arg5[%c0_15, %c0_16] : memref<16x1xf32, #tpu.memory_space<vmem>>, vector<16x1xf32>
    tpu.vector_store %arg5[%c0_15, %c0_16], %18 {strides = array<i32>} : memref<16x1xf32, #tpu.memory_space<vmem>>, vector<16x1xf32>,
    %c0_17 = arith.constant 0 : index
    %c0_18 = arith.constant 0 : index
    %35 = vector.load %arg7[%c0_17, %c0_18] : memref<16x1xf32, #tpu.memory_space<vmem>>, vector<16x1xf32>
    %36 = arith.addf %35, %16 : vector<16x1xf32>
    %c0_19 = arith.constant 0 : index
    %c0_20 = arith.constant 0 : index
    %37 = vector.load %arg7[%c0_19, %c0_20] : memref<16x1xf32, #tpu.memory_space<vmem>>, vector<16x1xf32>
    tpu.vector_store %arg7[%c0_19, %c0_20], %36 {strides = array<i32>} : memref<16x1xf32, #tpu.memory_space<vmem>>, vector<16x1xf32>,
    %c0_i32_21 = arith.constant 0 : i32
    %38 = arith.cmpi eq, %arg1, %c0_i32_21 : i32
    %39 = arith.extui %38 : i1 to i32
    %cst_22 = arith.constant 1.000000e+01 : f32
    %c0_i32_23 = arith.constant 0 : i32
    %40 = arith.cmpi ne, %39, %c0_i32_23 : i32
    scf.if %40 {
      %c0_24 = arith.constant 0 : index
      %c0_25 = arith.constant 0 : index
      %41 = vector.load %arg6[%c0_24, %c0_25] : memref<16x1xf32, #tpu.memory_space<vmem>>, vector<16x1xf32>
      %42 = math.log %41 : vector<16x1xf32>
      %c0_26 = arith.constant 0 : index
      %c0_27 = arith.constant 0 : index
      %43 = vector.load %arg5[%c0_26, %c0_27] : memref<16x1xf32, #tpu.memory_space<vmem>>, vector<16x1xf32>
      %c0_28 = arith.constant 0 : index
      %c0_29 = arith.constant 0 : index
      %44 = vector.load %arg7[%c0_28, %c0_29] : memref<16x1xf32, #tpu.memory_space<vmem>>, vector<16x1xf32>
      %45 = arith.subf %43, %44 : vector<16x1xf32>
      %46 = vector.broadcast %cst_22 : f32 to vector<16x1xf32>
      %47 = arith.mulf %46, %45 : vector<16x1xf32>
      %48 = arith.addf %42, %47 : vector<16x1xf32>
      %49 = tpu.iota {dimensions = array<i32: 0>} : vector<16x1xi32>
      %c16_i32 = arith.constant 16 : i32
      %50 = arith.muli %arg0, %c16_i32 : i32
      %51 = vector.broadcast %50 : i32 to vector<16x1xi32>
      %52 = arith.addi %49, %51 : vector<16x1xi32>
      %c40_i32 = arith.constant 40 : i32
      %53 = vector.broadcast %c40_i32 : i32 to vector<16x1xi32>
      %54 = arith.cmpi slt, %52, %53 : vector<16x1xi32>
      %cst_30 = arith.constant 0.000000e+00 : f32
      %55 = vector.broadcast %cst_30 : f32 to vector<16x1xf32>
      %56 = arith.select %54, %48, %55 : vector<16x1xi1>, vector<16x1xf32>
      %57 = vector.shape_cast %56 : vector<16x1xf32> to vector<1x16x1xf32>
      %cst_31 = arith.constant dense<0.000000e+00> : vector<1xf32>
      %58 = vector.multi_reduction <add>, %57, %cst_31 [1, 2] : vector<1x16x1xf32> to vector<1xf32>
      %59 = vector.shape_cast %58 : vector<1xf32> to vector<1x1x1xf32>
      %60 = vector.extract %59[0, 0, 0] : f32 from vector<1x1x1xf32>
      %61 = vector.broadcast %60 : f32 to vector<1x8x128xf32>
      %c0_32 = arith.constant 0 : index
      %c0_33 = arith.constant 0 : index
      %c0_34 = arith.constant 0 : index
      %62 = vector.load %arg4[%c0_32, %c0_33, %c0_34] : memref<1x8x128xf32, #tpu.memory_space<vmem>>, vector<1x8x128xf32>
      tpu.vector_store %arg4[%c0_32, %c0_33, %c0_34], %61 {strides = array<i32>} : memref<1x8x128xf32, #tpu.memory_space<vmem>>, vector<1x8x128xf32>,
    } else {
    }
    return
  }
  func.func @transform_0(%arg0: i32, %arg1: i32) -> (i32, i32) {
    %c0_i32 = arith.constant 0 : i32
    return %arg0, %arg1 : i32, i32
  }
  func.func @transform_1(%arg0: i32, %arg1: i32) -> (i32, i32) {
    %c0_i32 = arith.constant 0 : i32
    %c0_i32_0 = arith.constant 0 : i32
    return %arg0, %c0_i32 : i32, i32
  }
  func.func @transform_2(%arg0: i32, %arg1: i32) -> (i32, i32, i32) {
    %c0_i32 = arith.constant 0 : i32
    %c0_i32_0 = arith.constant 0 : i32
    %c0_i32_1 = arith.constant 0 : i32
    return %arg0, %c0_i32, %c0_i32_0 : i32, i32, i32
  }
}

</mosaic_0001>

<bundles_post_ra>
// kernel: tpu_custom_call.1
= control target key start
LH: loop header
LB: loop body
LE: loop exit
PB: predicated region body
PF: predicated region fallthrough
CT: control target
= control target key end

     0   :  { %7 = vsyncpa [#allocation6], 0  ;;  %s790_s0 = inlined_call_operand.vmem [shape: f32[40,32], index: 0, kind: input, shape index: {}]   ;;  %s791_s1 = inlined_call_operand.vmem [shape: s32[40,1], index: 1, kind: input, shape index: {}]   ;;  %s792_s2 = inlined_call_operand.hbm [shape: f32[3,8,128], index: 2, kind: output, shape index: {}]  }
   0x1   :  { %9 = vsyncpa [#allocation6 + $0x1], 0  ;;  %s653_s9 = smov 0   ;;  %s655_s10 = smov 0  }
   0x2   :  { %s657_s11 = smov 0   ;;  %s659_s12 = smov 0  }
   0x3   :  { %s661_s13 = smov 0   ;;  %s663_s14 = smov 0  }
   0x4 LB: > { %s465_s15 = sadd.s32 4294967295, %s632_s14   ;;  %s466_s16 = sadd.s32 4294967294, %s632_s14   ;;  %s632_s14 = sphi %s663_s14, %s15_s14   ;;  %s628_s13 = sphi %s661_s13, %s799_s13   ;;  %s624_s12 = sphi %s659_s12, %s798_s12   ;;  %s620_s11 = sphi %s657_s11, %s797_s11   ;;  %s616_s10 = sphi %s655_s10, %s796_s10   ;;  %s612_s9 = sphi %s653_s9, %s795_s9  }
   0x5   : > { %s27_s17 = sadd.s32 1, %s628_s13  ;;  %s88_s18 = sadd.s32 1, %s620_s11 }
   0x6   : > { %p29_p0 = scmp.ge.s32.totalorder %s27_s17, 3  ;;  %p98_p1 = scmp.ne.s32.totalorder %s620_s11, %s616_s10 }
   0x7   : > { %p99_p2 = scmp.eq.s32.totalorder %s465_s15, 2  ;;  %p104_p3 = scmp.ne.s32.totalorder %s616_s10, %s612_s9 }
   0x8   : > { %s801_s17 = smov (%p29_p0, %s27_s17), 0  ;;  %p105_p5 = scmp.eq.s32.totalorder %s466_s16, 2 }
   0x9   : > { %p693_p4 = por %p99_p2, %p98_p1  ;;  %s85_s20 = ssub.s32 %s628_s13, %s801_s17 }
   0xa   : > { %p469_p6 = scmp.ge.s32.totalorder %s632_s14, 1  ;;  %p86_p7 = scmp.eq.s32.totalorder %s85_s20, 0 }
   0xb   : > { %p700_p8 = por %p105_p5, %p104_p3  ;;  %p160_p9 = scmp.lt.s32.totalorder %s632_s14, 4 }
   0xc   : > { %s706_s22 = scalar_select %p86_p7, %s620_s11, %s88_s18  }
   0xd   : > { %p161_p10 = pnand %p469_p6, %p160_p9 }
   0xe   : > { %s471_s23 = sshll.u32 (!%p161_p10), %s624_s12, 1  ;;  %vm233_vm0 = vcmask (!%p161_p10), 7168   ;;  %v634_v0 = vmov (!%p161_p10), 0   ;;  %v635_v1 = vmov (!%p161_p10), -inf   ;;  %vm249_vm1 = vcmask (!%p161_p10), 261120   ;;  %s475_s3 = sshll.u32 (!%p161_p10), %s624_s12, 4 }
   0xf   : > { %164 = sbr.rel (%p161_p10) target bundleno = 711 (0x2c7), region = 28  ;;  %p203_p11 = scmp.lt.s32.totalorder (!%p161_p10), %s471_s23, 4  ;;  %541 = vset.pattern.permute.xlu0 (!%p161_p10), %v634_v0  ;;  %234 = vst.msk [vmem:[#allocation2] sm:$0xff] (!%p161_p10), %vm233_vm0, %v635_v1  ;;  %235 = vst.msk [vmem:[#allocation2 + $0x8] sm:$0xff] (!%p161_p10), %vm233_vm0, %v635_v1  ;;  %540 = vset.pattern.permute.xlu1 (!%p161_p10), %v634_v0  ;;  %v636_v7 = vmov (!%p161_p10), 0.0   ;;  %v244_v15 = vlaneseq (!%p161_p10)  ;;  %v348_v63 = vstv (!%p161_p10), %s475_s3 }
  0x10   : > { %238 = vst.msk [vmem:[#allocation4] sm:$0xff] (!%p161_p10), %vm233_vm0, %v636_v7  ;;  %236 = vst.msk [vmem:[#allocation3] sm:$0xff] (!%p161_p10), %vm233_vm0, %v636_v7  ;;  %s195_s4 = sand.u32 (!%p161_p10), 1, %s616_s10   ;;  %s477_s8 = sshll.u32 (!%p161_p10), %s624_s12, 7 }
  0x11   : > { %237 = vst.msk [vmem:[#allocation3 + $0x8] sm:$0xff] (!%p161_p10), %vm233_vm0, %v636_v7  ;;  %239 = vst.msk [vmem:[#allocation4 + $0x8] sm:$0xff] (!%p161_p10), %vm233_vm0, %v636_v7  ;;  %v245_v18 = vand.u32 (!%p161_p10), 127, %v244_v15  ;;  %v345_v60 = vshrl.u32 (!%p161_p10), %v244_v15, 7  ;;  %s470_s5 = sshll.u32 (!%p161_p10), %s195_s4, 3  ;;  %s745_s20 = scalar_lea.hbm (!%p161_p10), %s792_s2, %s477_s8 }
  0x12   : > { %s197_s6 = scalar_lea.vmem (!%p161_p10), [#allocation5], %s470_s5  ;;  %s637_s12 = smov (!%p161_p10), [#allocation5]  }
  0x13   : > { %v346_v1 = vadd.s32 (!%p161_p10), 8, %v345_v60  ;;  %s383_s7 = sshll.u32 (!%p161_p10), %s197_s6, 4  ;;  %s558_s25 = sshll.u32 (!%p161_p10), %s637_s12, 4  ;;  %s740_s7 = int_to_ptr.vmem [resolvable:$true] %s383_s7  ;;  %s559_s25 = int_to_ptr.vmem [resolvable:$false] %s558_s25 }
  0x14   : > { %s560_s26 = scalar_lea.vmem (!%p161_p10), %s559_s25, 256  ;;  %p561_p1 = scmp.lt.s32.totalorder (!%p161_p10), %s740_s7, %s559_s25 }
  0x16   : > { %s803_s23 = smov (!%p203_p11, %s471_s23), 4  ;;  %v272_v8 = vld [vmem:[#allocation2] sm:$0xff]  ;;  %v273_v11 = vld [vmem:[#allocation2 + $0x8] sm:$0xff] }
  0x17   : > { %s472_s24 = sshll.u32 %s803_s23, 3  ;;  %v319_v36 = vld [vmem:[#allocation4] sm:$0xff]  ;;  %v294_v45 = vld [vmem:[#allocation3] sm:$0xff]  ;;  %s370_s23 = scalar_lea.sflag [#allocation6], %s195_s4 }
  0x18   : > { %s209_s27 = scalar_lea.vmem %s790_s0, %s472_s24  ;;  %s223_s30 = scalar_lea.vmem %s791_s1, %s472_s24  ;;  %v295_v49 = vld [vmem:[#allocation3 + $0x8] sm:$0xff]  ;;  %v320_v54 = vld [vmem:[#allocation4 + $0x8] sm:$0xff] }
  0x19   : > { %v240_v2 = vld [vmem:[%s209_s27] sm:$0xff]  ;;  %v241_v3 = vld [vmem:[%s209_s27 + $0x8] sm:$0xff]  ;;  %s554_s24 = scalar_lea.vmem %s740_s7, 128 }
  0x1a   : > { %v250_v4 = vsel %vm249_vm1, %v240_v2, -inf  ;;  %v253_v5 = vsel %vm249_vm1, %v241_v3, -inf  ;;  %v242_v6 = vld [vmem:[%s223_s30] sm:$0xff]  ;;  %v243_v17 = vld [vmem:[%s223_s30 + $0x8] sm:$0xff]  ;;  %p555_p12 = scmp.ne.s32.totalorder %s740_s7, %s554_s24  ;;  %p562_p2 = scmp.lt.s32.totalorder %s560_s26, %s554_s24 }
  0x1b   : > { %251 = vmax.xlane.f32.xlu0 %v250_v4  ;;  %v349_v4 = vadd.s32 %v348_v63, %v345_v60 }
  0x1c   : > { %p556_p13 = pnand %p555_p12, %p693_p4  ;;  %p563_p3 = por %p562_p2, %p561_p1 }
  0x1d   : > { %vm351_vm4 = vcmp.lt.s32.totalorder %v349_v4, 40 }
  0x1e   : > { %p557_p0 = pneg %p556_p13 }
  0x1f   : > { %254 = vmax.xlane.f32.xlu0 %v253_v5 }
  0x20   : > { %p564_p5 = pnand %p563_p3, %p557_p0 }
  0x35   : > { %257 = vperm.xlu0 %541, %v242_v6  }
  0xa8   : > { %v252_v9 = vpop.xlane.xlu0 %251 }
  0xa9   : > { %v274_v10 = vmax.f32 %v272_v8, %v252_v9 }
  0xab   : > { %v296_v12 = vsub.f32 %v272_v8, %v274_v10  ;;  %317 = vst.msk [vmem:[#allocation2] sm:$0xff] %vm233_vm0, %v274_v10  ;;  %278 = vperm.xlu1 %540, %v274_v10   ;;  %v350_v8 = vadd.s32 %v348_v63, %v346_v1 }
  0xac   : > { %v255_v13 = vpop.xlane.xlu0 %254 }
  0xad   : > { %v275_v14 = vmax.f32 %v273_v11, %v255_v13  ;;  %v298_v40 = vmul.f32 10.0, %v296_v12  ;;  %vm352_vm5 = vcmp.lt.s32.totalorder %v350_v8, 40 }
  0xaf   : > { %v297_v16 = vsub.f32 %v273_v11, %v275_v14  ;;  %318 = vst.msk [vmem:[#allocation2 + $0x8] sm:$0xff] %vm233_vm0, %v275_v14  ;;  %283 = vperm.xlu1 %540, %v275_v14   ;;  %v300_v41 = vmul.f32 1.442695, %v298_v40 }
  0xb1   : > { %v299_v42 = vmul.f32 10.0, %v297_v16 }
  0xb2   : > { %v334_v61 = vld [vmem:[#allocation2] sm:$0xff] }
  0xb3   : > { %260 = vperm.xlu1 %540, %v243_v17   ;;  %v302_v43 = vmul.f32 1.442695, %v299_v42 }
  0xb4   : > { %v258_v19 = vpop.permute.xlu0 %257 }
  0xb5   : > { %vm262_vm2 = vcmp.eq.s32.totalorder %v245_v18, %v258_v19 }
  0xb6   : > { %v264_v20 = vsel %vm262_vm2, %v240_v2, 0.0 }
  0xb7   : > { %v266_v21 = vsel %vm249_vm1, %v264_v20, 0.0 }
  0xb8   : > { %267 = vadd.xlane.f32.xlu0 %v266_v21 }
 0x12a   : > { %v279_v22 = vpop.permute.xlu1 %278 }
 0x12b   : > { %v286_v23 = vsub.f32 %v240_v2, %v279_v22 }
 0x12d   : > { %v288_v24 = vmul.f32 10.0, %v286_v23 }
 0x12e   : > { %v284_v25 = vpop.permute.xlu1 %283 }
 0x12f   : > { %v290_v26 = vmul.f32 1.442695, %v288_v24  ;;  %v287_v27 = vsub.f32 %v241_v3, %v284_v25 }
 0x131   : > { %542 = vpow2.f32 %v290_v26  ;;  %v289_v28 = vmul.f32 10.0, %v287_v27 }
 0x132   : > { %v261_v31 = vpop.permute.xlu1 %260 }
 0x133   : > { %v292_v29 = vmul.f32 1.442695, %v289_v28  ;;  %vm263_vm3 = vcmp.eq.s32.totalorder %v245_v18, %v261_v31 }
 0x134   : > { %v265_v35 = vsel %vm263_vm3, %v241_v3, 0.0  ;;  %v335_v3 = vld [vmem:[#allocation2 + $0x8] sm:$0xff] }
 0x135   : > { %544 = vpow2.f32 %v292_v29  ;;  %v269_v37 = vsel %vm249_vm1, %v265_v35, 0.0 }
 0x136   : > { %546 = vpow2.f32 %v300_v41 }
 0x137   : > { %548 = vpow2.f32 %v302_v43 }
 0x13b   : > { %v543_v30 = vpop.eup %542 }
 0x13c   : > { %v306_v32 = vsel %vm249_vm1, %v543_v30, 0.0 }
 0x13d   : > { %307 = vadd.xlane.f32.xlu1 %v306_v32 }
 0x13f   : > { %v545_v33 = vpop.eup %544 }
 0x140   : > { %v309_v34 = vsel %vm249_vm1, %v545_v33, 0.0  ;;  %v547_v44 = vpop.eup %546 }
 0x141   : > { %310 = vadd.xlane.f32.xlu1 %v309_v34  ;;  %v304_v46 = vmul.f32 %v547_v44, %v294_v45  ;;  %v549_v47 = vpop.eup %548 }
 0x142   : > { %v305_v51 = vmul.f32 %v549_v47, %v295_v49 }
 0x145   : > { %270 = vadd.xlane.f32.xlu1 %v269_v37  ;;  %v268_v38 = vpop.xlane.xlu0 %267 }
 0x146   : > { %v321_v39 = vadd.f32 %v319_v36, %v268_v38 }
 0x148   : > { %323 = vst.msk [vmem:[#allocation4] sm:$0xff] %vm233_vm0, %v321_v39 }
 0x14f   : > { %v336_v59 = vld [vmem:[#allocation4] sm:$0xff] }
 0x150   : > { %v338_v62 = vsub.f32 %v334_v61, %v336_v59 }
 0x152   : > { %v340_v7 = vmul.f32 10.0, %v338_v62 }
 0x1ca   : > { %v308_v48 = vpop.xlane.xlu1 %307 }
 0x1cb   : > { %v312_v50 = vadd.f32 %v308_v48, %v304_v46 }
 0x1cd   : > { %315 = vst.msk [vmem:[#allocation3] sm:$0xff] %vm233_vm0, %v312_v50 }
 0x1ce   : > { %v311_v52 = vpop.xlane.xlu1 %310 }
 0x1cf   : > { %v313_v53 = vadd.f32 %v311_v52, %v305_v51 }
 0x1d1   : > { %316 = vst.msk [vmem:[#allocation3 + $0x8] sm:$0xff] %vm233_vm0, %v313_v53 }
 0x1d2   : > { %v271_v55 = vpop.xlane.xlu1 %270 }
 0x1d3   : > { %v322_v56 = vadd.f32 %v320_v54, %v271_v55 }
 0x1d4   : > { %v328_v57 = vld [vmem:[#allocation3] sm:$0xff] }
 0x1d5   : > { %324 = vst.msk [vmem:[#allocation4 + $0x8] sm:$0xff] %vm233_vm0, %v322_v56  ;;  %550 = vlog2.f32 %v328_v57 }
 0x1d8   : > { %v329_v58 = vld [vmem:[#allocation3 + $0x8] sm:$0xff] }
 0x1d9   : > { %552 = vlog2.f32 %v329_v58 }
 0x1dc   : > { %v337_v0 = vld [vmem:[#allocation4 + $0x8] sm:$0xff] }
 0x1dd   : > { %v339_v6 = vsub.f32 %v335_v3, %v337_v0 }
 0x1df   : > { %v551_v2 = vpop.eup %550  ;;  %v341_v12 = vmul.f32 10.0, %v339_v6 }
 0x1e0   : > { %v331_v5 = vmul.f32 0.6931472, %v551_v2 }
 0x1e2   : > { %v342_v9 = vadd.f32 %v340_v7, %v331_v5 }
 0x1e3   : > { %v553_v10 = vpop.eup %552 }
 0x1e4   : > { %v333_v11 = vmul.f32 0.6931472, %v553_v10  ;;  %v353_v14 = vsel %vm351_vm4, %v342_v9, 0.0 }
 0x1e5   : > { %v355_v16 = vsel %vm233_vm0, %v353_v14, 0.0 }
 0x1e6   : > { %v343_v13 = vadd.f32 %v341_v12, %v333_v11 }
 0x1e8   : > { %v354_v15 = vsel %vm352_vm5, %v343_v13, 0.0 }
 0x1e9   : > { %v356_v17 = vsel %vm233_vm0, %v354_v15, 0.0 }
 0x1ea   : > { %v357_v18 = vadd.f32 %v356_v17, %v355_v16 }
 0x1ec   : > { %358 = vadd.xlane.f32.xlu1 %v357_v18 }
 0x279   : > { %v359_v19 = vpop.xlane.xlu1 %358 }
 0x27a   : > { %v360_v20 = vrot.slane %v359_v19, 4 }
 0x27c   : > { %v361_v21 = vadd.f32 %v360_v20, %v359_v19 }
 0x27e   : > { %v362_v22 = vrot.slane %v361_v21, 2 }
 0x280   : > { %v363_v23 = vadd.f32 %v362_v22, %v361_v21 }
 0x282   : > { %v364_v24 = vrot.slane %v363_v23, 1 }
 0x284   : > { %v365_v25 = vadd.f32 %v364_v24, %v363_v23 }
 0x286   : > { %480 = vpush %v365_v25 }
 0x2b7   : > { %s481_s15 = spop %480 }
 0x2b8   : > { %v367_v26 = vstv %s481_s15 }
 0x2b9   : > { %368 = vst [vmem:[%s197_s6] sm:$0xff] %v367_v26 }
 0x2ba   : > { %567 = shalt.err (!%p564_p5)
}
 0x2bb   : > { %s568_s27 = scalar_lea.hbm %s745_s20, 128  ;;  %s572_s30 = scalar_lea.hbm %s792_s2, 384 }
 0x2bc   : > { %p569_p6 = scmp.ne.s32.totalorder %s745_s20, %s568_s27  ;;  %p573_p10 = scmp.lt.u32.totalorder %s745_s20, %s792_s2 }
 0x2bd   : > { %p574_p11 = scmp.lt.u32.totalorder %s572_s30, %s568_s27  ;;  %p576_p13 = scmp.lt.u32.totalorder %s568_s27, %s745_s20 }
 0x2be   : > { %p570_p7 = pnand %p569_p6, %p693_p4 }
 0x2bf   : > { %p575_p12 = por %p574_p11, %p573_p10 }
 0x2c0   : > { %p571_p9 = pneg %p570_p7 }
 0x2c1   : > { %p577_p0 = por %p576_p13, %p575_p12 }
 0x2c3   : > { %p578_p1 = pnand %p577_p0, %p571_p9 }
 0x2c5   : > { %581 = shalt.err (!%p578_p1)
}
 0x2c6   : > { %482 = dma.vmem_to_hbm [thread:$0]  (%p693_p4), %s740_s7, 128, %s745_s20, %s370_s23  }
 0x2c7 PF: > { %p488_p2 = scmp.ge.s32.totalorder %s632_s14, 2  ;;  %s395_s5 = sand.u32 1, %s612_s9  }
 0x2c8   : > { %s396_s6 = scalar_lea.sflag [#allocation6], %s395_s5 }
 0x2c9   : > { %p485_p3 = pnand %p488_p2, %p700_p8 }
 0x2cb   : > { %607 = dma.done.wait (!%p485_p3), %s396_s6, 128  }
 0x2cc   : > { %609 = vsyncadd (!%p485_p3), %s396_s6, 4294967168  ;;  %s15_s14 = sadd.s32 1, %s632_s14   ;;  %s795_s9 = smov %s616_s10 }
 0x2cd   : > { %p12_p5 = scmp.ge.s32.totalorder %s15_s14, 5   ;;  %s796_s10 = smov %s620_s11 }
 0x2ce   : > { %s797_s11 = smov %s706_s22  ;;  %s798_s12 = smov %s628_s13 }
 0x2cf   : > { %s799_s13 = smov %s801_s17  ;;  %14 = sbr.rel (!%p12_p5) target bundleno = 4 (0x4), region = 74 }
 0x2d6   :  { %401 = vsyncpa [#allocation6], 1 }
 0x2d7   :  { %403 = vsyncpa [#allocation6 + $0x1], 1 }

</bundles_post_ra>
